<compile_context>
chip_gen: v6e
topology: v6e:2x2x1
jax: 0.10.0
libtpu: 0.0.40
codegen_flags: <defaults>
</compile_context>

<pallas_src>
import math

import numpy as np

import jax
import jax.numpy as jnp
from jax.experimental import pallas as pl
from jax.experimental.pallas import tpu as pltpu


def _round_up(a: int, b: int) -> int:
    return ((a + b - 1) // b) * b


def _tap_params(l_in: int, l_out: int, l_out_pad: int):
    """Per-output-sample 2-tap parameters (PyTorch linear, align_corners=False).

    Returns numpy arrays of length l_out_pad:
      x0  (int32): low-tap input index
      x1  (int32): high-tap input index (== x0 at the right boundary)
      lam (f32)  : blend factor, out = (1-lam)*x[x0] + lam*x[x1]
    Padded output columns (m >= l_out) replicate the last real column (sliced off later).
    """
    scale = l_in / l_out
    m = np.minimum(np.arange(l_out_pad), l_out - 1).astype(np.float64)
    src = np.maximum((m + 0.5) * scale - 0.5, 0.0)          # PyTorch clamps below at 0
    x0 = np.minimum(np.floor(src), l_in - 1).astype(np.int64)
    x1 = np.minimum(x0 + 1, l_in - 1)
    lam = (src - x0).astype(np.float32)
    return x0.astype(np.int32), x1.astype(np.int32), lam


def _banded_interp_kernel(klo_ref, x_ref, x0_ref, x1_ref, lam_ref, o_ref, acc_ref):
    """One (row_tile, out_tile, k) grid step of the banded interpolation matmul.

    klo_ref : (n_out_tiles,) SMEM scalar-prefetch, band start K-block per out tile
    x_ref   : (TM, KB)  input band K-block (global cols [(klo[j]+k)*KB, ...+KB))
    x0/x1   : (1, TN)   global input indices of the 2 taps of this out tile
    lam     : (1, TN)   blend factor of the high tap
    o_ref   : (TM, TN)  output tile (written on the last k step)
    acc_ref : (TM, TN)  f32 accumulator scratch
    """
    j = pl.program_id(1)
    k = pl.program_id(2)
    kb = x_ref.shape[1]
    tn = o_ref.shape[1]

    @pl.when(k == 0)
    def _init():
        acc_ref[...] = jnp.zeros_like(acc_ref)

    # Build the (KB, TN) two-tap weight block from O(TN) tap data. Rows whose global
    # index matches neither x0 nor x1 of this out tile get exactly zero weight, so the
    # extra K blocks of a band contribute nothing and there is no double counting.
    # (At the right boundary x0 == x1 and the two selects sum to (1-lam)+lam = 1.)
    base = (klo_ref[j] + k) * kb
    row_ids = jax.lax.broadcasted_iota(jnp.int32, (kb, tn), 0) + base
    x0 = x0_ref[...]
    x1 = x1_ref[...]
    lam = lam_ref[...]
    w = (jnp.where(row_ids == x0, 1.0 - lam, 0.0)
         + jnp.where(row_ids == x1, lam, 0.0))

    xv = x_ref[...]
    wv = w if xv.dtype == jnp.float32 else w.astype(xv.dtype)  # keep bf16 MXU operands
    acc_ref[...] += jnp.dot(xv, wv, preferred_element_type=jnp.float32)

    @pl.when(k == pl.num_programs(2) - 1)
    def _finalize():
        o_ref[...] = acc_ref[...].astype(o_ref.dtype)


def _interp_rows(x2d, l_out: int):
    """Linear-resample every row of x2d (rows, L_in) to (rows, l_out) on TPU."""
    rows, l_in = x2d.shape
    dtype = x2d.dtype

    # Tile sizes: lane-dense output tiles (multiple of 128, up to 512), sublane-aligned
    # row tiles, K blocks of 256 input samples.
    TN = min(512, _round_up(max(l_out, 1), 128))
    TM = min(256, _round_up(max(rows, 1), 8))
    KB = 256

    l_out_pad = _round_up(l_out, TN)
    rows_pad = _round_up(rows, TM)
    n_ot = l_out_pad // TN

    # O(L_out) tap parameters and the per-out-tile K-block band (all static / host-side).
    x0, x1, lam = _tap_params(l_in, l_out, l_out_pad)
    x0_t = x0.reshape(n_ot, TN)
    x1_t = x1.reshape(n_ot, TN)
    klo = (x0_t.min(axis=1) // KB).astype(np.int32)          # first K block of each band
    khi = (x1_t.max(axis=1) // KB).astype(np.int32)          # last K block of each band
    NK = int((khi - klo).max()) + 1                          # K steps per out tile (1-3 typ.)
    l_in_pad = max(int(klo.max()) * KB + NK * KB, _round_up(l_in, KB))

    x_p = jnp.pad(x2d, ((0, rows_pad - rows), (0, l_in_pad - l_in)))
    x0_d = jnp.asarray(x0.reshape(1, l_out_pad))
    x1_d = jnp.asarray(x1.reshape(1, l_out_pad))
    lam_d = jnp.asarray(lam.reshape(1, l_out_pad))
    klo_d = jnp.asarray(klo)                                  # scalar-prefetch (SMEM)

    grid = (rows_pad // TM, n_ot, NK)

    out_p = pl.pallas_call(
        _banded_interp_kernel,
        out_shape=jax.ShapeDtypeStruct((rows_pad, l_out_pad), dtype),
        grid_spec=pltpu.PrefetchScalarGridSpec(
            num_scalar_prefetch=1,
            grid=grid,
            in_specs=[
                # x: only the K band of this output tile is fetched.
                pl.BlockSpec((TM, KB), lambda i, j, k, klo_ref: (i, klo_ref[j] + k)),
                pl.BlockSpec((1, TN), lambda i, j, k, klo_ref: (0, j)),
                pl.BlockSpec((1, TN), lambda i, j, k, klo_ref: (0, j)),
                pl.BlockSpec((1, TN), lambda i, j, k, klo_ref: (0, j)),
            ],
            out_specs=pl.BlockSpec((TM, TN), lambda i, j, k, klo_ref: (i, j)),
            scratch_shapes=[pltpu.VMEM((TM, TN), jnp.float32)],
        ),
        compiler_params=pltpu.CompilerParams(
            dimension_semantics=("parallel", "parallel", "arbitrary"),
        ),
    )(klo_d, x_p, x0_d, x1_d, lam_d)

    return out_p[:rows, :l_out]


def interpolate(x, size=None, scale_factor=None, mode="linear"):
    """Mirror of Interpolate.forward (1-D linear resample, align_corners=False)."""
    if mode != "linear":
        raise NotImplementedError("only mode='linear' is implemented")
        # TODO(synk): other F.interpolate modes (nearest, etc.) not implemented.
    had_batch = x.ndim == 3
    if not had_batch:                 # add_batch_dimension
        x = x[None, ...]
    b, c, l_in = x.shape

    if size is not None:
        l_out = int(size)
    elif scale_factor is not None:
        l_out = int(math.floor(l_in * float(scale_factor)))
        # TODO(synk): PyTorch with recompute_scale_factor=False uses 1/scale_factor for the
        # source-index scale; here we use l_in/l_out (identical whenever l_in*scale is exact).
    else:
        raise ValueError("either size or scale_factor must be given")

    x2d = x.reshape(b * c, l_in)
    if l_out == l_in:
        out2d = x2d                   # identity resample fast path
    else:
        out2d = _interp_rows(x2d, l_out)
    out = out2d.reshape(b, c, l_out)
    if not had_batch:                 # remove_batch_dimension
        out = out[0]
    return out


class Interpolate:
    """JAX/Pallas port of torchsense Interpolate (no parameters)."""

    def __init__(self, size=None, scale_factor=None, mode="linear"):
        self.size = size
        self.scale_factor = scale_factor
        self.mode = mode

    def __call__(self, x):
        return interpolate(x, size=self.size, scale_factor=self.scale_factor, mode=self.mode)


def _ref_linear_interp(x, size):
    """Pure-JAX reference: gather the two taps and lerp (no Pallas, no matmul)."""
    had_batch = x.ndim == 3
    if not had_batch:
        x = x[None, ...]
    l_in = x.shape[-1]
    x0, x1, lam = _tap_params(l_in, size, size)
    lam = jnp.asarray(lam)
    lo = jnp.take(x, jnp.asarray(x0), axis=-1).astype(jnp.float32)
    hi = jnp.take(x, jnp.asarray(x1), axis=-1).astype(jnp.float32)
    out = (lo * (1.0 - lam) + hi * lam).astype(x.dtype)
    return out if had_batch else out[0]


if __name__ == "__main__":
    key = jax.random.PRNGKey(0)
    k1, k2, k3 = jax.random.split(key, 3)

    # 1) 2-D waveform (C, L): upsample 16 -> 32 (original demo case).
    C, L_in, L_out = 4, 16, 32
    x = jax.random.normal(k1, (C, L_in), dtype=jnp.float32)
    y = jax.block_until_ready(Interpolate(size=L_out)(x))
    assert y.shape == (C, L_out), y.shape
    assert jnp.allclose(y, _ref_linear_interp(x, L_out), atol=2e-5, rtol=2e-5)

    # 2) 3-D batched input with awkward sizes: downsample 1000 -> 777
    #    (exercises multiple output tiles, multi-K-block bands, row/lane padding).
    B, C2, L2_in, L2_out = 2, 3, 1000, 777
    x2 = jax.random.normal(k2, (B, C2, L2_in), dtype=jnp.float32)
    y2 = jax.block_until_ready(Interpolate(size=L2_out)(x2))
    assert y2.shape == (B, C2, L2_out), y2.shape
    assert jnp.allclose(y2, _ref_linear_interp(x2, L2_out), atol=2e-5, rtol=2e-5)

    # 3) scale_factor path: upsample 640 -> 1280.
    C3, L3_in = 4, 640
    x3 = jax.random.normal(k3, (C3, L3_in), dtype=jnp.float32)
    y3 = jax.block_until_ready(Interpolate(scale_factor=2.0)(x3))
    assert y3.shape == (C3, 1280), y3.shape
    assert jnp.allclose(y3, _ref_linear_interp(x3, 1280), atol=2e-5, rtol=2e-5)

    print("KERNEL_OK")
</pallas_src>

<mosaic_0001>
module attributes {stable_mosaic.version = 11 : i64} {
  func.func @_banded_interp_kernel(%arg0: i32, %arg1: i32, %arg2: i32, %arg3: memref<1xi32, #tpu.memory_space<smem>>, %arg4: memref<8x256xf32, #tpu.memory_space<vmem>>, %arg5: memref<1x128xi32, #tpu.memory_space<vmem>>, %arg6: memref<1x128xi32, #tpu.memory_space<vmem>>, %arg7: memref<1x128xf32, #tpu.memory_space<vmem>>, %arg8: memref<8x128xf32, #tpu.memory_space<vmem>>, %arg9: memref<8x128xf32, #tpu.memory_space<vmem>>) attributes {dimension_semantics = [#tpu.dimension_semantics<parallel>, #tpu.dimension_semantics<parallel>, #tpu.dimension_semantics<arbitrary>], iteration_bounds = array<i64: 1, 1, 1>, scalar_prefetch = 1 : i64, scratch_operands = 1 : i64, tpu.core_type = #tpu.core_type<tc>, window_params = [{transform_indices = @transform_0, window_bounds = array<i64: 8, 256>}, {transform_indices = @transform_1, window_bounds = array<i64: 1, 128>}, {transform_indices = @transform_2, window_bounds = array<i64: 1, 128>}, {transform_indices = @transform_3, window_bounds = array<i64: 1, 128>}, {transform_indices = @transform_4, window_bounds = array<i64: 8, 128>}]} {
    %c0_i32 = arith.constant 0 : i32
    %0 = arith.cmpi eq, %arg2, %c0_i32 : i32
    %1 = arith.extui %0 : i1 to i32
    %c0_i32_0 = arith.constant 0 : i32
    %2 = arith.cmpi ne, %1, %c0_i32_0 : i32
    scf.if %2 {
      %cst_17 = arith.constant 0.000000e+00 : f32
      %36 = vector.broadcast %cst_17 : f32 to vector<8x128xf32>
      %c0_18 = arith.constant 0 : index
      %c0_19 = arith.constant 0 : index
      %37 = vector.load %arg9[%c0_18, %c0_19] : memref<8x128xf32, #tpu.memory_space<vmem>>, vector<8x128xf32>
      tpu.vector_store %arg9[%c0_18, %c0_19], %36 {strides = array<i32>} : memref<8x128xf32, #tpu.memory_space<vmem>>, vector<8x128xf32>,
    } else {
    }
    %3 = arith.index_cast %arg1 : i32 to index
    %4 = memref.load %arg3[%3] : memref<1xi32, #tpu.memory_space<smem>>
    %5 = arith.addi %4, %arg2 : i32
    %c256_i32 = arith.constant 256 : i32
    %6 = arith.muli %5, %c256_i32 : i32
    %7 = tpu.iota {dimensions = array<i32: 0>} : vector<256x128xi32>
    %8 = vector.broadcast %6 : i32 to vector<256x128xi32>
    %9 = arith.addi %7, %8 : vector<256x128xi32>
    %c0 = arith.constant 0 : index
    %c0_1 = arith.constant 0 : index
    %10 = vector.load %arg5[%c0, %c0_1] : memref<1x128xi32, #tpu.memory_space<vmem>>, vector<1x128xi32>
    %c0_2 = arith.constant 0 : index
    %c0_3 = arith.constant 0 : index
    %11 = vector.load %arg6[%c0_2, %c0_3] : memref<1x128xi32, #tpu.memory_space<vmem>>, vector<1x128xi32>
    %c0_4 = arith.constant 0 : index
    %c0_5 = arith.constant 0 : index
    %12 = vector.load %arg7[%c0_4, %c0_5] : memref<1x128xf32, #tpu.memory_space<vmem>>, vector<1x128xf32>
    %13 = vector.broadcast %10 : vector<1x128xi32> to vector<256x128xi32>
    %14 = arith.cmpi eq, %9, %13 : vector<256x128xi32>
    %cst = arith.constant 1.000000e+00 : f32
    %15 = vector.broadcast %cst : f32 to vector<1x128xf32>
    %16 = arith.subf %15, %12 : vector<1x128xf32>
    %cst_6 = arith.constant 0.000000e+00 : f32
    %17 = vector.shape_cast %16 : vector<1x128xf32> to vector<1x128xf32>
    %18 = vector.broadcast %17 : vector<1x128xf32> to vector<256x128xf32>
    %19 = vector.broadcast %cst_6 : f32 to vector<256x128xf32>
    %20 = arith.select %14, %18, %19 : vector<256x128xi1>, vector<256x128xf32>
    %21 = vector.broadcast %11 : vector<1x128xi32> to vector<256x128xi32>
    %22 = arith.cmpi eq, %9, %21 : vector<256x128xi32>
    %cst_7 = arith.constant 0.000000e+00 : f32
    %23 = vector.shape_cast %12 : vector<1x128xf32> to vector<1x128xf32>
    %24 = vector.broadcast %23 : vector<1x128xf32> to vector<256x128xf32>
    %25 = vector.broadcast %cst_7 : f32 to vector<256x128xf32>
    %26 = arith.select %22, %24, %25 : vector<256x128xi1>, vector<256x128xf32>
    %27 = arith.addf %20, %26 : vector<256x128xf32>
    %c0_8 = arith.constant 0 : index
    %c0_9 = arith.constant 0 : index
    %28 = vector.load %arg4[%c0_8, %c0_9] : memref<8x256xf32, #tpu.memory_space<vmem>>, vector<8x256xf32>
    %c0_10 = arith.constant 0 : index
    %c0_11 = arith.constant 0 : index
    %29 = vector.load %arg9[%c0_10, %c0_11] : memref<8x128xf32, #tpu.memory_space<vmem>>, vector<8x128xf32>
    %cst_12 = arith.constant dense<0.000000e+00> : vector<8x128xf32>
    %30 = tpu.matmul %28, %27, %cst_12 {dimension_numbers = #tpu.dot_dimension_numbers<[1], [0], [0], [1], [0, 0, 1, 1], [], []>} : vector<8x256xf32>, vector<256x128xf32>, vector<8x128xf32> -> vector<8x128xf32>
    %31 = arith.addf %29, %30 : vector<8x128xf32>
    %c0_13 = arith.constant 0 : index
    %c0_14 = arith.constant 0 : index
    %32 = vector.load %arg9[%c0_13, %c0_14] : memref<8x128xf32, #tpu.memory_space<vmem>>, vector<8x128xf32>
    tpu.vector_store %arg9[%c0_13, %c0_14], %31 {strides = array<i32>} : memref<8x128xf32, #tpu.memory_space<vmem>>, vector<8x128xf32>,
    %c0_i32_15 = arith.constant 0 : i32
    %33 = arith.cmpi eq, %arg2, %c0_i32_15 : i32
    %34 = arith.extui %33 : i1 to i32
    %c0_i32_16 = arith.constant 0 : i32
    %35 = arith.cmpi ne, %34, %c0_i32_16 : i32
    scf.if %35 {
      %c0_17 = arith.constant 0 : index
      %c0_18 = arith.constant 0 : index
      %36 = vector.load %arg9[%c0_17, %c0_18] : memref<8x128xf32, #tpu.memory_space<vmem>>, vector<8x128xf32>
      %c0_19 = arith.constant 0 : index
      %c0_20 = arith.constant 0 : index
      %37 = vector.load %arg8[%c0_19, %c0_20] : memref<8x128xf32, #tpu.memory_space<vmem>>, vector<8x128xf32>
      tpu.vector_store %arg8[%c0_19, %c0_20], %36 {strides = array<i32>} : memref<8x128xf32, #tpu.memory_space<vmem>>, vector<8x128xf32>,
    } else {
    }
    return
  }
  func.func @transform_0(%arg0: i32, %arg1: i32, %arg2: i32, %arg3: memref<1xi32, #tpu.memory_space<smem>>) -> (i32, i32) {
    %0 = arith.index_cast %arg1 : i32 to index
    %1 = memref.load %arg3[%0] : memref<1xi32, #tpu.memory_space<smem>>
    %2 = arith.addi %1, %arg2 : i32
    %c0_i32 = arith.constant 0 : i32
    return %arg0, %2 : i32, i32
  }
  func.func @transform_1(%arg0: i32, %arg1: i32, %arg2: i32, %arg3: memref<1xi32, #tpu.memory_space<smem>>) -> (i32, i32) {
    %c0_i32 = arith.constant 0 : i32
    %c0_i32_0 = arith.constant 0 : i32
    return %c0_i32, %arg1 : i32, i32
  }
  func.func @transform_2(%arg0: i32, %arg1: i32, %arg2: i32, %arg3: memref<1xi32, #tpu.memory_space<smem>>) -> (i32, i32) {
    %c0_i32 = arith.constant 0 : i32
    %c0_i32_0 = arith.constant 0 : i32
    return %c0_i32, %arg1 : i32, i32
  }
  func.func @transform_3(%arg0: i32, %arg1: i32, %arg2: i32, %arg3: memref<1xi32, #tpu.memory_space<smem>>) -> (i32, i32) {
    %c0_i32 = arith.constant 0 : i32
    %c0_i32_0 = arith.constant 0 : i32
    return %c0_i32, %arg1 : i32, i32
  }
  func.func @transform_4(%arg0: i32, %arg1: i32, %arg2: i32, %arg3: memref<1xi32, #tpu.memory_space<smem>>) -> (i32, i32) {
    %c0_i32 = arith.constant 0 : i32
    return %arg0, %arg1 : i32, i32
  }
}

</mosaic_0001>

<bundles_post_ra>
// kernel: tpu_custom_call.1
= control target key start
LH: loop header
LB: loop body
LE: loop exit
PB: predicated region body
PF: predicated region fallthrough
CT: control target
= control target key end

     0   :  { %11 = vsyncpa [#allocation6], 0  ;;  %s747_s0 = inlined_call_operand.<no memory space> [shape: s32[1], index: 0, kind: input, shape index: {}]   ;;  %s748_s1 = inlined_call_operand.hbm [shape: f32[8,256], index: 1, kind: input, shape index: {}]   ;;  %s749_s2 = inlined_call_operand.vmem [shape: s32[1,128], index: 2, kind: input, shape index: {}]   ;;  %s750_s3 = inlined_call_operand.vmem [shape: s32[1,128], index: 3, kind: input, shape index: {}]   ;;  %s751_s4 = inlined_call_operand.vmem [shape: f32[1,128], index: 4, kind: input, shape index: {}]   ;;  %s752_s5 = inlined_call_operand.hbm [shape: f32[8,128], index: 5, kind: output, shape index: {}]  }
   0x1   :  { %12 = vsyncpa [#allocation7], 0  ;;  %s400_s20 = sshll.u32 %s747_s0, 8  ;;  %s484_s24 = smov [#allocation5]  }
   0x2   :  { %s22_s23 = scalar_lea.hbm %s748_s1, %s400_s20  ;;  %s24_s25 = sshll.u32 %s484_s24, 4  ;;  %s25_s25 = int_to_ptr.vmem [resolvable:$true] %s24_s25 }
   0x3   :  { %s438_s26 = scalar_lea.hbm %s22_s23, 256  ;;  %s440_s29 = scalar_lea.hbm %s748_s1, 256 }
   0x4   :  { %p439_p0 = scmp.ne.s32.totalorder %s22_s23, %s438_s26  ;;  %p441_p1 = scmp.lt.s32.totalorder %s22_s23, %s748_s1 }
   0x5   :  { %p442_p2 = scmp.lt.s32.totalorder %s440_s29, %s438_s26 }
   0x7   :  { %p443_p3 = por %p442_p2, %p441_p1 }
   0x9   :  { %p444_p4 = pnand %p443_p3, %p439_p0 }
   0xb   :  { %447 = shalt.err (!%p444_p4)
}
   0xc   :  { %s448_s0 = scalar_lea.vmem %s25_s25, 256  ;;  %p453_p6 = scmp.lt.s32.totalorder %s25_s25, %s25_s25 }
   0xd   :  { %p449_p5 = scmp.ne.s32.totalorder %s25_s25, %s448_s0  ;;  %p454_p7 = scmp.lt.s32.totalorder %s448_s0, %s448_s0 }
   0xf   :  { %p455_p8 = por %p454_p7, %p453_p6 }
  0x11   :  { %p456_p9 = pnand %p455_p8, %p449_p5 }
  0x13   :  { %459 = shalt.err (!%p456_p9)
}
  0x14   :  { %27 = dma.hbm_to_vmem [thread:$0]  %s22_s23, 256, %s25_s25, [#allocation6]  }
  0x15   :  { %480 = dma.done.wait [#allocation6], 256  }
  0x16   :  { %481 = vsyncadd [#allocation6], 4294967040  ;;  %v48_v0 = vlaneseq  ;;  %v530_v2 = vstv %s400_s20  ;;  %v547_v15 = vld [vmem:[%s749_s2] ss:$0 sm:$0xff]  ;;  %v299_v24 = vld [vmem:[#allocation5 + $0x8] sm:$0xff]  ;;  %s485_s2 = smov [#allocation8]  }
  0x17   :  { %v552_v16 = vld [vmem:[%s750_s3] ss:$0 sm:$0xff]  ;;  %365 = vmatprep.mubr.f32.mxu0 %v299_v24  ;;  %s384_s3 = sshll.u32 %s485_s2, 4  ;;  %s385_s3 = int_to_ptr.vmem [resolvable:$true] %s384_s3 }
  0x18   :  { %v528_v1 = vshrl.u32 %v48_v0, 7  ;;  %v116_v17 = vld [vmem:[%s751_s4] sm:$0x1]  ;;  %s460_s4 = scalar_lea.vmem %s385_s3, 128  ;;  %p465_p11 = scmp.lt.s32.totalorder %s385_s3, %s385_s3 }
  0x19   :  { %v153_v22 = vsub.f32 1.0, %v116_v17  ;;  %p461_p10 = scmp.ne.s32.totalorder %s385_s3, %s460_s4  ;;  %p466_p12 = scmp.lt.s32.totalorder %s460_s4, %s460_s4 }
  0x1a   :  { %v157_v3 = vsub.s32 0, %v528_v1  ;;  %v80_v4 = vadd.s32 248, %v528_v1  ;;  %v64_v5 = vadd.s32 120, %v528_v1  ;;  %v79_v6 = vadd.s32 240, %v528_v1 }
  0x1b   :  { %v63_v7 = vadd.s32 112, %v528_v1  ;;  %v78_v8 = vadd.s32 232, %v528_v1  ;;  %v62_v9 = vadd.s32 104, %v528_v1  ;;  %v77_v10 = vadd.s32 224, %v528_v1  ;;  %p467_p13 = por %p466_p12, %p465_p11 }
  0x1c   :  { %v113_v11 = vadd.s32 %v530_v2, %v80_v4  ;;  %v97_v12 = vadd.s32 %v530_v2, %v64_v5  ;;  %v112_v13 = vadd.s32 %v530_v2, %v79_v6  ;;  %v61_v14 = vadd.s32 96, %v528_v1 }
  0x1d   :  { %v96_v18 = vadd.s32 %v530_v2, %v63_v7  ;;  %v111_v19 = vadd.s32 %v530_v2, %v78_v8  ;;  %v95_v20 = vadd.s32 %v530_v2, %v62_v9  ;;  %v110_v21 = vadd.s32 %v530_v2, %v77_v10  ;;  %p468_p0 = pnand %p467_p13, %p461_p10 }
  0x1e   :  { %v561_v23 = vrot.slane %v116_v17, %v157_v3  ;;  %vm152_vm0 = vcmp.eq.s32.totalorder %v113_v11, %v547_v15  ;;  %vm227_vm1 = vcmp.eq.s32.totalorder %v113_v11, %v552_v16  ;;  %vm136_vm2 = vcmp.eq.s32.totalorder %v97_v12, %v547_v15 }
  0x1f   :  { %vm211_vm3 = vcmp.eq.s32.totalorder %v97_v12, %v552_v16  ;;  %vm151_vm4 = vcmp.eq.s32.totalorder %v112_v13, %v547_v15  ;;  %vm226_vm5 = vcmp.eq.s32.totalorder %v112_v13, %v552_v16  ;;  %v569_v25 = vrot.slane %v153_v22, %v157_v3 }
  0x20   :  { %v265_v26 = vsel %vm227_vm1, %v561_v23, 0.0  ;;  %v249_v27 = vsel %vm211_vm3, %v561_v23, 0.0  ;;  %v264_v28 = vsel %vm226_vm5, %v561_v23, 0.0  ;;  %vm135_vm6 = vcmp.eq.s32.totalorder %v96_v18, %v547_v15 }
  0x21   :  { %vm210_vm7 = vcmp.eq.s32.totalorder %v96_v18, %v552_v16  ;;  %vm150_vm8 = vcmp.eq.s32.totalorder %v111_v19, %v547_v15  ;;  %vm225_vm9 = vcmp.eq.s32.totalorder %v111_v19, %v552_v16  ;;  %v191_v29 = vsel %vm152_vm0, %v569_v25, 0.0 }
  0x22   :  { %v175_v30 = vsel %vm136_vm2, %v569_v25, 0.0  ;;  %v190_v31 = vsel %vm151_vm4, %v569_v25, 0.0  ;;  %v174_v32 = vsel %vm135_vm6, %v569_v25, 0.0  ;;  %v297_v33 = vadd.f32 %v265_v26, %v191_v29 }
  0x23   :  { %v281_v34 = vadd.f32 %v249_v27, %v175_v30  ;;  %v296_v35 = vadd.f32 %v264_v28, %v190_v31  ;;  %v248_v36 = vsel %vm210_vm7, %v561_v23, 0.0  ;;  %v189_v38 = vsel %vm150_vm8, %v569_v25, 0.0 }
  0x24   :  { %v280_v37 = vadd.f32 %v248_v36, %v174_v32  ;;  %v263_v39 = vsel %vm225_vm9, %v561_v23, 0.0  ;;  %vm134_vm10 = vcmp.eq.s32.totalorder %v95_v20, %v547_v15  ;;  %401 = vmatprep.subr.mxu0 %v297_v33  ;;  %vm209_vm11 = vcmp.eq.s32.totalorder %v95_v20, %v552_v16 }
  0x25   :  { %v295_v40 = vadd.f32 %v263_v39, %v189_v38  ;;  %v173_v41 = vsel %vm134_vm10, %v569_v25, 0.0  ;;  %vm149_vm12 = vcmp.eq.s32.totalorder %v110_v21, %v547_v15  ;;  %402 = vmatpush3.msra.mxu0 %v281_v34  ;;  %v247_v42 = vsel %vm209_vm11, %v561_v23, 0.0 }
  0x26   :  { %v188_v43 = vsel %vm149_vm12, %v569_v25, 0.0  ;;  %vm224_vm13 = vcmp.eq.s32.totalorder %v110_v21, %v552_v16  ;;  %v94_v44 = vadd.s32 %v530_v2, %v61_v14  ;;  %403 = vmatprep.subr.mxu0 %v296_v35  ;;  %v279_v45 = vadd.f32 %v247_v42, %v173_v41 }
  0x27   :  { %v262_v46 = vsel %vm224_vm13, %v561_v23, 0.0  ;;  %v76_v47 = vadd.s32 216, %v528_v1  ;;  %v60_v48 = vadd.s32 88, %v528_v1  ;;  %404 = vmatpush3.msra.mxu0 %v280_v37  ;;  %v75_v50 = vadd.s32 208, %v528_v1 }
  0x28   :  { %v294_v49 = vadd.f32 %v262_v46, %v188_v43  ;;  %vm133_vm14 = vcmp.eq.s32.totalorder %v94_v44, %v547_v15  ;;  %vm208_vm15 = vcmp.eq.s32.totalorder %v94_v44, %v552_v16  ;;  %405 = vmatprep.subr.mxu0 %v295_v40  ;;  %v59_v57 = vadd.s32 80, %v528_v1 }
  0x29   :  { %v172_v51 = vsel %vm133_vm14, %v569_v25, 0.0  ;;  %v246_v52 = vsel %vm208_vm15, %v561_v23, 0.0  ;;  %v109_v53 = vadd.s32 %v530_v2, %v76_v47  ;;  %v93_v54 = vadd.s32 %v530_v2, %v60_v48  ;;  %406 = vmatpush3.msra.mxu0 %v279_v45 }
  0x2a   :  { %v278_v55 = vadd.f32 %v246_v52, %v172_v51  ;;  %v108_v56 = vadd.s32 %v530_v2, %v75_v50  ;;  %v74_v58 = vadd.s32 200, %v528_v1  ;;  %407 = vmatprep.subr.mxu0 %v294_v49  ;;  %v92_v5 = vadd.s32 %v530_v2, %v59_v57 }
  0x2b   :  { %vm148_vm0 = vcmp.eq.s32.totalorder %v109_v53, %v547_v15  ;;  %vm223_vm1 = vcmp.eq.s32.totalorder %v109_v53, %v552_v16  ;;  %vm132_vm2 = vcmp.eq.s32.totalorder %v93_v54, %v547_v15  ;;  %vm207_vm3 = vcmp.eq.s32.totalorder %v93_v54, %v552_v16 }
  0x2c   :  { %408 = vmatpush3.msra.mxu0 %v278_v55  ;;  %v187_v59 = vsel %vm148_vm0, %v569_v25, 0.0  ;;  %v261_v60 = vsel %vm223_vm1, %v561_v23, 0.0  ;;  %v171_v61 = vsel %vm132_vm2, %v569_v25, 0.0  ;;  %v245_v62 = vsel %vm207_vm3, %v561_v23, 0.0 }
  0x2d   :  { %v293_v63 = vadd.f32 %v261_v60, %v187_v59  ;;  %v277_v0 = vadd.f32 %v245_v62, %v171_v61  ;;  %vm147_vm4 = vcmp.eq.s32.totalorder %v108_v56, %v547_v15  ;;  %vm222_vm5 = vcmp.eq.s32.totalorder %v108_v56, %v552_v16 }
  0x2e   :  { %v186_v3 = vsel %vm147_vm4, %v569_v25, 0.0  ;;  %v260_v4 = vsel %vm222_vm5, %v561_v23, 0.0  ;;  %v107_v6 = vadd.s32 %v530_v2, %v74_v58  ;;  %v58_v8 = vadd.s32 72, %v528_v1 }
  0x2f   :  { %409 = vmatprep.subr.mxu0 %v293_v63  ;;  %v292_v7 = vadd.f32 %v260_v4, %v186_v3  ;;  %v73_v9 = vadd.s32 192, %v528_v1  ;;  %v57_v10 = vadd.s32 64, %v528_v1  ;;  %vm131_vm6 = vcmp.eq.s32.totalorder %v92_v5, %v547_v15 }
  0x30   :  { %410 = vmatpush3.msra.mxu0 %v277_v0  ;;  %vm206_vm7 = vcmp.eq.s32.totalorder %v92_v5, %v552_v16  ;;  %vm146_vm8 = vcmp.eq.s32.totalorder %v107_v6, %v547_v15  ;;  %vm221_vm9 = vcmp.eq.s32.totalorder %v107_v6, %v552_v16  ;;  %v170_v11 = vsel %vm131_vm6, %v569_v25, 0.0 }
  0x31   :  { %411 = vmatprep.subr.mxu0 %v292_v7  ;;  %v244_v12 = vsel %vm206_vm7, %v561_v23, 0.0  ;;  %v185_v13 = vsel %vm146_vm8, %v569_v25, 0.0  ;;  %v259_v14 = vsel %vm221_vm9, %v561_v23, 0.0  ;;  %v91_v19 = vadd.s32 %v530_v2, %v58_v8 }
  0x32   :  { %v276_v17 = vadd.f32 %v244_v12, %v170_v11  ;;  %v291_v18 = vadd.f32 %v259_v14, %v185_v13  ;;  %v106_v20 = vadd.s32 %v530_v2, %v73_v9  ;;  %v90_v21 = vadd.s32 %v530_v2, %v57_v10 }
  0x33   :  { %v72_v22 = vadd.s32 184, %v528_v1  ;;  %v56_v24 = vadd.s32 56, %v528_v1  ;;  %v71_v26 = vadd.s32 176, %v528_v1  ;;  %vm130_vm10 = vcmp.eq.s32.totalorder %v91_v19, %v547_v15 }
  0x34   :  { %412 = vmatpush3.msra.mxu0 %v276_v17  ;;  %vm205_vm11 = vcmp.eq.s32.totalorder %v91_v19, %v552_v16  ;;  %vm145_vm12 = vcmp.eq.s32.totalorder %v106_v20, %v547_v15  ;;  %vm220_vm13 = vcmp.eq.s32.totalorder %v106_v20, %v552_v16  ;;  %v169_v27 = vsel %vm130_vm10, %v569_v25, 0.0 }
  0x35   :  { %413 = vmatprep.subr.mxu0 %v291_v18  ;;  %v243_v28 = vsel %vm205_vm11, %v561_v23, 0.0  ;;  %v184_v29 = vsel %vm145_vm12, %v569_v25, 0.0  ;;  %v258_v30 = vsel %vm220_vm13, %v561_v23, 0.0  ;;  %vm129_vm14 = vcmp.eq.s32.totalorder %v90_v21, %v547_v15 }
  0x36   :  { %v275_v31 = vadd.f32 %v243_v28, %v169_v27  ;;  %v290_v32 = vadd.f32 %v258_v30, %v184_v29  ;;  %vm204_vm15 = vcmp.eq.s32.totalorder %v90_v21, %v552_v16  ;;  %v168_v33 = vsel %vm129_vm14, %v569_v25, 0.0 }
  0x37   :  { %v242_v34 = vsel %vm204_vm15, %v561_v23, 0.0  ;;  %v105_v35 = vadd.s32 %v530_v2, %v72_v22  ;;  %v89_v36 = vadd.s32 %v530_v2, %v56_v24  ;;  %v104_v38 = vadd.s32 %v530_v2, %v71_v26 }
  0x38   :  { %414 = vmatpush3.msra.mxu0 %v275_v31  ;;  %v274_v37 = vadd.f32 %v242_v34, %v168_v33  ;;  %v55_v39 = vadd.s32 48, %v528_v1  ;;  %v70_v40 = vadd.s32 168, %v528_v1  ;;  %v54_v52 = vadd.s32 40, %v528_v1 }
  0x39   :  { %415 = vmatprep.subr.mxu0 %v290_v32  ;;  %vm144_vm0 = vcmp.eq.s32.totalorder %v105_v35, %v547_v15  ;;  %vm219_vm1 = vcmp.eq.s32.totalorder %v105_v35, %v552_v16  ;;  %vm128_vm2 = vcmp.eq.s32.totalorder %v89_v36, %v547_v15  ;;  %vm203_vm3 = vcmp.eq.s32.totalorder %v89_v36, %v552_v16 }
  0x3a   :  { %416 = vmatpush3.msra.mxu0 %v274_v37  ;;  %v183_v41 = vsel %vm144_vm0, %v569_v25, 0.0  ;;  %v257_v42 = vsel %vm219_vm1, %v561_v23, 0.0  ;;  %v167_v43 = vsel %vm128_vm2, %v569_v25, 0.0  ;;  %v241_v44 = vsel %vm203_vm3, %v561_v23, 0.0 }
  0x3b   :  { %v289_v45 = vadd.f32 %v257_v42, %v183_v41  ;;  %v273_v46 = vadd.f32 %v241_v44, %v167_v43  ;;  %vm143_vm4 = vcmp.eq.s32.totalorder %v104_v38, %v547_v15  ;;  %vm218_vm5 = vcmp.eq.s32.totalorder %v104_v38, %v552_v16 }
  0x3c   :  { %v182_v47 = vsel %vm143_vm4, %v569_v25, 0.0  ;;  %v256_v48 = vsel %vm218_vm5, %v561_v23, 0.0  ;;  %v88_v49 = vadd.s32 %v530_v2, %v55_v39  ;;  %v103_v50 = vadd.s32 %v530_v2, %v70_v40 }
  0x3d   :  { %417 = vmatprep.subr.mxu0 %v289_v45  ;;  %v288_v51 = vadd.f32 %v256_v48, %v182_v47  ;;  %v69_v53 = vadd.s32 160, %v528_v1  ;;  %v53_v54 = vadd.s32 32, %v528_v1  ;;  %v87_v61 = vadd.s32 %v530_v2, %v54_v52 }
  0x3e   :  { %418 = vmatpush3.msra.mxu0 %v273_v46  ;;  %vm127_vm6 = vcmp.eq.s32.totalorder %v88_v49, %v547_v15  ;;  %vm202_vm7 = vcmp.eq.s32.totalorder %v88_v49, %v552_v16  ;;  %vm142_vm8 = vcmp.eq.s32.totalorder %v103_v50, %v547_v15  ;;  %vm217_vm9 = vcmp.eq.s32.totalorder %v103_v50, %v552_v16 }
  0x3f   :  { %419 = vmatprep.subr.mxu0 %v288_v51  ;;  %v166_v55 = vsel %vm127_vm6, %v569_v25, 0.0  ;;  %v240_v56 = vsel %vm202_vm7, %v561_v23, 0.0  ;;  %v181_v57 = vsel %vm142_vm8, %v569_v25, 0.0  ;;  %v255_v58 = vsel %vm217_vm9, %v561_v23, 0.0 }
  0x40   :  { %v272_v59 = vadd.f32 %v240_v56, %v166_v55  ;;  %v287_v60 = vadd.f32 %v255_v58, %v181_v57  ;;  %v102_v62 = vadd.s32 %v530_v2, %v69_v53  ;;  %v86_v63 = vadd.s32 %v530_v2, %v53_v54 }
  0x41   :  { %v68_v0 = vadd.s32 152, %v528_v1  ;;  %v52_v3 = vadd.s32 24, %v528_v1  ;;  %v67_v4 = vadd.s32 144, %v528_v1  ;;  %vm126_vm10 = vcmp.eq.s32.totalorder %v87_v61, %v547_v15 }
  0x42   :  { %420 = vmatpush3.msra.mxu0 %v272_v59  ;;  %vm201_vm11 = vcmp.eq.s32.totalorder %v87_v61, %v552_v16  ;;  %vm141_vm12 = vcmp.eq.s32.totalorder %v102_v62, %v547_v15  ;;  %vm216_vm13 = vcmp.eq.s32.totalorder %v102_v62, %v552_v16  ;;  %v165_v5 = vsel %vm126_vm10, %v569_v25, 0.0 }
  0x43   :  { %421 = vmatprep.subr.mxu0 %v287_v60  ;;  %v239_v6 = vsel %vm201_vm11, %v561_v23, 0.0  ;;  %v180_v7 = vsel %vm141_vm12, %v569_v25, 0.0  ;;  %v254_v8 = vsel %vm216_vm13, %v561_v23, 0.0  ;;  %vm125_vm14 = vcmp.eq.s32.totalorder %v86_v63, %v547_v15 }
  0x44   :  { %v271_v9 = vadd.f32 %v239_v6, %v165_v5  ;;  %v286_v10 = vadd.f32 %v254_v8, %v180_v7  ;;  %vm200_vm15 = vcmp.eq.s32.totalorder %v86_v63, %v552_v16  ;;  %v164_v11 = vsel %vm125_vm14, %v569_v25, 0.0 }
  0x45   :  { %v238_v12 = vsel %vm200_vm15, %v561_v23, 0.0  ;;  %v101_v13 = vadd.s32 %v530_v2, %v68_v0  ;;  %v85_v14 = vadd.s32 %v530_v2, %v52_v3  ;;  %v100_v18 = vadd.s32 %v530_v2, %v67_v4 }
  0x46   :  { %422 = vmatpush3.msra.mxu0 %v271_v9  ;;  %v270_v17 = vadd.f32 %v238_v12, %v164_v11  ;;  %v51_v19 = vadd.s32 16, %v528_v1  ;;  %v66_v20 = vadd.s32 136, %v528_v1  ;;  %v50_v34 = vadd.s32 8, %v528_v1 }
  0x47   :  { %423 = vmatprep.subr.mxu0 %v286_v10  ;;  %vm140_vm0 = vcmp.eq.s32.totalorder %v101_v13, %v547_v15  ;;  %vm215_vm1 = vcmp.eq.s32.totalorder %v101_v13, %v552_v16  ;;  %vm124_vm2 = vcmp.eq.s32.totalorder %v85_v14, %v547_v15  ;;  %vm199_vm3 = vcmp.eq.s32.totalorder %v85_v14, %v552_v16 }
  0x48   :  { %424 = vmatpush3.msra.mxu0 %v270_v17  ;;  %v179_v21 = vsel %vm140_vm0, %v569_v25, 0.0  ;;  %v253_v22 = vsel %vm215_vm1, %v561_v23, 0.0  ;;  %v163_v24 = vsel %vm124_vm2, %v569_v25, 0.0  ;;  %v237_v26 = vsel %vm199_vm3, %v561_v23, 0.0 }
  0x49   :  { %v285_v27 = vadd.f32 %v253_v22, %v179_v21  ;;  %v269_v28 = vadd.f32 %v237_v26, %v163_v24  ;;  %vm139_vm4 = vcmp.eq.s32.totalorder %v100_v18, %v547_v15  ;;  %vm214_vm5 = vcmp.eq.s32.totalorder %v100_v18, %v552_v16 }
  0x4a   :  { %v178_v29 = vsel %vm139_vm4, %v569_v25, 0.0  ;;  %v252_v30 = vsel %vm214_vm5, %v561_v23, 0.0  ;;  %v84_v31 = vadd.s32 %v530_v2, %v51_v19  ;;  %v99_v32 = vadd.s32 %v530_v2, %v66_v20 }
  0x4b   :  { %425 = vmatprep.subr.mxu0 %v285_v27  ;;  %v284_v33 = vadd.f32 %v252_v30, %v178_v29  ;;  %v65_v35 = vadd.s32 128, %v528_v1  ;;  %v82_v36 = vadd.s32 %v530_v2, %v528_v1  ;;  %v83_v42 = vadd.s32 %v530_v2, %v50_v34 }
  0x4c   :  { %426 = vmatpush3.msra.mxu0 %v269_v28  ;;  %vm123_vm6 = vcmp.eq.s32.totalorder %v84_v31, %v547_v15  ;;  %vm198_vm7 = vcmp.eq.s32.totalorder %v84_v31, %v552_v16  ;;  %vm138_vm8 = vcmp.eq.s32.totalorder %v99_v32, %v547_v15  ;;  %vm213_vm9 = vcmp.eq.s32.totalorder %v99_v32, %v552_v16 }
  0x4d   :  { %427 = vmatprep.subr.mxu0 %v284_v33  ;;  %v162_v37 = vsel %vm123_vm6, %v569_v25, 0.0  ;;  %v236_v38 = vsel %vm198_vm7, %v561_v23, 0.0  ;;  %v177_v39 = vsel %vm138_vm8, %v569_v25, 0.0  ;;  %v251_v40 = vsel %vm213_vm9, %v561_v23, 0.0 }
  0x4e   :  { %v268_v41 = vadd.f32 %v236_v38, %v162_v37  ;;  %v283_v1 = vadd.f32 %v251_v40, %v177_v39  ;;  %v98_v43 = vadd.s32 %v530_v2, %v65_v35  ;;  %vm121_vm10 = vcmp.eq.s32.totalorder %v82_v36, %v547_v15 }
  0x4f   :  { %vm196_vm11 = vcmp.eq.s32.totalorder %v82_v36, %v552_v16  ;;  %vm122_vm12 = vcmp.eq.s32.totalorder %v83_v42, %v547_v15  ;;  %vm197_vm13 = vcmp.eq.s32.totalorder %v83_v42, %v552_v16  ;;  %v160_v49 = vsel %vm121_vm10, %v569_v25, 0.0 }
  0x50   :  { %428 = vmatpush3.msra.mxu0 %v268_v41  ;;  %vm137_vm14 = vcmp.eq.s32.totalorder %v98_v43, %v547_v15  ;;  %vm212_vm15 = vcmp.eq.s32.totalorder %v98_v43, %v552_v16  ;;  %v161_v44 = vsel %vm122_vm12, %v569_v25, 0.0  ;;  %v235_v45 = vsel %vm197_vm13, %v561_v23, 0.0  ;;  %v298_v15 = vld [vmem:[#allocation5] sm:$0xff] }
  0x51   :  { %429 = vmatprep.subr.mxu0 %v283_v1  ;;  %v176_v2 = vsel %vm137_vm14, %v569_v25, 0.0  ;;  %v250_v46 = vsel %vm212_vm15, %v561_v23, 0.0  ;;  %v267_v47 = vadd.f32 %v235_v45, %v161_v44  ;;  %v234_v50 = vsel %vm196_vm11, %v561_v23, 0.0 }
  0x52   :  { %v282_v48 = vadd.f32 %v250_v46, %v176_v2  ;;  %v266_v51 = vadd.f32 %v234_v50, %v160_v49 }
  0x53   :  { %430 = vmatpush3.msra.mxu0 %v267_v47 }
  0x54   :  { %431 = vmatprep.subr.mxu0 %v282_v48 }
  0x55   :  { %432 = vmatpush3.msra.mxu0 %v266_v51 }
  0x56   :  { %366 = vmatmul.mubr.f32.vlgmr.msra.gmra.mxu0 %v298_v15 }
 0x116   :  { %v433_v16 = vpop.f32.mrf.mxu0 }
 0x118   :  { %v434_v52 = vpop.f32.mrf.mxu0 }
 0x119   :  { %v435_v53 = vadd.f32 %v434_v52, %v433_v16 }
 0x11b   :  { %377 = vst [vmem:[#allocation8] sm:$0xff] %v435_v53 }
 0x11c   :  { %471 = shalt.err (!%p468_p0)
}
 0x11d   :  { %387 = dma.vmem_to_hbm [thread:$0]  %s385_s3, 128, %s752_s5, [#allocation7]  }
 0x11e   :  { %482 = dma.done.wait [#allocation7], 128  }
 0x11f   :  { %483 = vsyncadd [#allocation7], 4294967168 }
 0x120   :  { %391 = vsyncpa [#allocation6], 1 }
 0x121   :  { %392 = vsyncpa [#allocation7], 1 }

</bundles_post_ra>
